<compile_context>
chip_gen: v6e
topology: v6e:2x2x1
jax: 0.10.0
libtpu: 0.0.40
codegen_flags: <defaults>
</compile_context>

<pallas_src>
import math
import functools

import jax
import jax.numpy as jnp
from jax.experimental import pallas as pl
from jax.experimental.pallas import tpu as pltpu

EPS = 1e-5
ACT_DTYPE = jnp.bfloat16   # inter-layer activations
W_DTYPE = jnp.bfloat16     # matmul weights

# Cap on the sepconv row-block height: bounds the DMA halo overhead (2*dil extra rows per
# block) against pipeline granularity and keeps per-step working sets modest.
_MAX_TH = 32


# ----------------------------------------------------------------------------
# Generation-aware helpers (tiling / VMEM limits / compute dtype)
# ----------------------------------------------------------------------------
def _round_up(x, m):
    return (x + m - 1) // m * m


def _cpad(c):
    """Pad channel counts >= 128 to a multiple of 128 (728 -> 768) for lane density."""
    return c if c < 128 else _round_up(c, 128)


@functools.lru_cache()
def _device_kind():
    try:
        return jax.devices()[0].device_kind.lower()
    except Exception:
        return ""


@functools.lru_cache()
def _vmem_cap():
    cap = 128 * 1024 * 1024
    try:
        cap = int(getattr(pltpu.get_tpu_info(), "vmem_capacity_bytes", cap))
    except Exception:
        pass
    if "v7" in _device_kind():                 # v7x: 64 MiB per TensorCore
        cap = min(cap, 64 * 1024 * 1024)
    return cap


@functools.lru_cache()
def _vmem_limit():
    # ~5/8 of physical, capped at 64 MiB (128 MiB parts) / 40 MiB (v7x).
    return int(min(64 * 1024 * 1024, _vmem_cap() * 5 // 8))


@functools.lru_cache()
def _block_budget():
    """Per-grid-step VMEM working-set target for the fused stride-1 sepconv kernel."""
    return 12 * 1024 * 1024 if _vmem_cap() <= 96 * 1024 * 1024 else 20 * 1024 * 1024


@functools.lru_cache()
def _dw_dtype():
    # v5e VPU has no native bf16 -> accumulate the depthwise taps in f32 there;
    # v6e/v7x have bf16 VALUs, halving the depthwise VPU cost and VMEM temp traffic.
    return jnp.float32 if "v5" in _device_kind() else jnp.bfloat16


@functools.lru_cache()
def _target_tm():
    # 256-row M tiles everywhere: the 1x1 skip / stem matmuls are memory-bound, bigger tiles
    # amortize the ~0.35us per-step overhead (and fill the 2x256^2 MXU on v6e/v7x).
    return 256


def _maybe_buffered(shape, index_map, nbuf):
    """BlockSpec with deeper multi-buffering when supported by the running JAX version."""
    if nbuf is not None:
        try:
            return pl.BlockSpec(shape, index_map, pipeline_mode=pl.Buffered(nbuf))
        except Exception:
            pass
    return pl.BlockSpec(shape, index_map)


# ----------------------------------------------------------------------------
# Pallas kernels
# ----------------------------------------------------------------------------
def _matmul_bn_kernel(x_ref, w_ref, sc_ref, sh_ref, o_ref, *, out_relu):
    """y = relu?( (x @ w) * scale + shift )   (bf16 operands, fp32 accumulation)."""
    acc = jnp.dot(x_ref[...], w_ref[...], preferred_element_type=jnp.float32)
    y = acc * sc_ref[...] + sh_ref[...]
    if out_relu:
        y = jnp.maximum(y, 0.0)
    o_ref[...] = y.astype(o_ref.dtype)


def _sepconv_s1_kernel(xp_ref, dw_ref, pw_ref, sco_ref, sho_ref, *rest,
                       th, Wo, dil, input_relu, out_relu, has_res, cdt):
    """Fused stride-1 SeparableConv2d:
       double-buffered manual DMA of the needed (padded) input rows -> depthwise 3x3
       (inner BN pre-folded into the weights) -> pointwise matmul + outer BN
       (+ residual) (+ ReLU in/out)."""
    if has_res:
        res_ref, o_ref, xbuf, sem = rest
    else:
        o_ref, xbuf, sem = rest
        res_ref = None

    n = pl.program_id(0)
    hb = pl.program_id(1)
    n_hb = pl.num_programs(1)
    th_in = th + 2 * dil
    slot = hb % 2

    def row_copy(hb_idx, s):
        return pltpu.make_async_copy(
            xp_ref.at[n, pl.ds(hb_idx * th, th_in)], xbuf.at[s], sem.at[s])

    @pl.when(hb == 0)              # prime the pipeline at the first row block of this image
    def _():
        row_copy(hb, slot).start()

    @pl.when(hb + 1 < n_hb)        # prefetch the next row block while computing this one
    def _():
        row_copy(hb + 1, 1 - slot).start()

    row_copy(hb, slot).wait()

    # Hoisted: one ReLU / cast pass over the whole row block (relu(0)=0 -> padding exact).
    xf = xbuf[slot]
    if input_relu:
        xf = jnp.maximum(xf, 0)
    xf = xf.astype(cdt)

    cin = xf.shape[-1]
    w_all = dw_ref[...].astype(cdt)                      # (9, Cin), inner BN scale pre-folded
    acc = jnp.zeros((th, Wo, cin), cdt)
    # TODO(synk): the kw tap slices below are not sublane aligned; a pltpu.roll-based
    #             formulation (shift on the XLU slot, single slice at the end) would remove
    #             the remaining relayout copies.
    for kh in range(3):
        xrow = xf[kh * dil:kh * dil + th]                # outer-axis slice: cheap
        for kw in range(3):
            wt = w_all[kh * 3 + kw].reshape(1, 1, cin)
            acc = acc + xrow[:, kw * dil:kw * dil + Wo, :] * wt

    y = jnp.dot(acc.reshape(th * Wo, cin).astype(jnp.bfloat16), pw_ref[...],
                preferred_element_type=jnp.float32)
    y = y * sco_ref[...] + sho_ref[...]
    y = y.reshape(1, th, Wo, y.shape[-1])
    if has_res:
        y = y + res_ref[...].astype(jnp.float32)
    if out_relu:
        y = jnp.maximum(y, 0.0)
    o_ref[...] = y.astype(o_ref.dtype)


def _sepconv_taps_kernel(taps_ref, dw_ref, pw_ref, sco_ref, sho_ref, *rest,
                         input_relu, out_relu, has_res, cdt):
    """Fused SeparableConv2d over pre-extracted taps (stride-2 layers and tiny-spatial
    stride-1 layers where batch*H*W is flattened into the matmul M dimension)."""
    if has_res:
        res_ref, o_ref = rest
    else:
        (o_ref,) = rest
        res_ref = None
    cin = taps_ref.shape[-1]
    tm = taps_ref.shape[1]
    w_all = dw_ref[...].astype(cdt)                      # (9, Cin), inner BN scale pre-folded
    acc = jnp.zeros((tm, cin), cdt)
    for t in range(9):
        xt = taps_ref[t]
        if input_relu:
            xt = jnp.maximum(xt, 0)
        acc = acc + xt.astype(cdt) * w_all[t].reshape(1, cin)
    y = jnp.dot(acc.astype(jnp.bfloat16), pw_ref[...], preferred_element_type=jnp.float32)
    y = y * sco_ref[...] + sho_ref[...]
    if has_res:
        y = y + res_ref[...].astype(jnp.float32)
    if out_relu:
        y = jnp.maximum(y, 0.0)
    o_ref[...] = y.astype(o_ref.dtype)


# ----------------------------------------------------------------------------
# Wrappers (JAX glue + pallas_call plumbing)
# ----------------------------------------------------------------------------
def matmul_bn(x, w, scale, shift, out_relu=False):
    """x: (M, K) bf16, w: (K, N) bf16. Fused matmul + per-channel BN + optional ReLU."""
    M, K = x.shape
    N = w.shape[1]
    tm = min(_target_tm(), _round_up(M, 8))
    Mp = _round_up(M, tm)
    if Mp != M:
        x = jnp.pad(x, ((0, Mp - M), (0, 0)))
    kernel = functools.partial(_matmul_bn_kernel, out_relu=out_relu)
    out = pl.pallas_call(
        kernel,
        out_shape=jax.ShapeDtypeStruct((Mp, N), ACT_DTYPE),
        grid=(Mp // tm,),
        in_specs=[pl.BlockSpec((tm, K), lambda i: (i, 0)),
                  pl.BlockSpec((K, N), lambda i: (0, 0)),
                  pl.BlockSpec((1, N), lambda i: (0, 0)),
                  pl.BlockSpec((1, N), lambda i: (0, 0))],
        out_specs=pl.BlockSpec((tm, N), lambda i: (i, 0)),
        compiler_params=pltpu.CompilerParams(
            dimension_semantics=("parallel",),
            vmem_limit_bytes=_vmem_limit()),
    )(x.astype(jnp.bfloat16), w, scale, shift)
    return out if Mp == M else out[:M]


def conv2d_bn(x, conv, scale, shift, *, stride, padding, out_relu=False):
    """Dense Conv2d(bias=False) + BN (+ReLU) via im2col + Pallas matmul.  x is NHWC bf16."""
    # TODO(synk): conv1/conv2 still build the im2col patch matrix in XLA; a direct-read
    #             tap-grid kernel would cut their HBM traffic further.
    w = conv['w']
    k = conv['k']
    N, H, W, Cin = x.shape
    Cout = w.shape[1]
    xp = jnp.pad(x, ((0, 0), (padding, padding), (padding, padding), (0, 0)))
    Ho = (H + 2 * padding - k) // stride + 1
    Wo = (W + 2 * padding - k) // stride + 1
    cols = []
    for kh in range(k):
        for kw in range(k):
            cols.append(xp[:, kh:kh + (Ho - 1) * stride + 1:stride,
                              kw:kw + (Wo - 1) * stride + 1:stride, :])
    patches = jnp.concatenate(cols, axis=-1).reshape(N * Ho * Wo, k * k * Cin)
    y = matmul_bn(patches, w, scale, shift, out_relu=out_relu)
    return y.reshape(N, Ho, Wo, Cout)


def _pick_th(Ho, Wo, Cin, Cout, dil, has_res):
    """Row-block height: largest th (capped) whose per-step working set fits the
    generation-aware VMEM budget; th need not divide Ho (rows are padded)."""
    cdt_bytes = 2 if _dw_dtype() == jnp.bfloat16 else 4
    Wp = Wo + 2 * dil

    def est(th):
        th_in = th + 2 * dil
        b = 2 * th_in * Wp * Cin * 2            # double-buffered DMA row blocks (bf16)
        b += th_in * Wp * Cin * cdt_bytes       # relu'd / cast input temp
        b += th * Wo * Cin * (cdt_bytes + 2)    # depthwise accumulator + bf16 matmul operand
        b += th * Wo * Cout * 4                 # f32 pointwise result
        b += 2 * th * Wo * Cout * 2             # double-buffered output block
        if has_res:
            b += 2 * th * Wo * Cout * 2         # double-buffered residual block
        return b

    fixed = 2 * Cin * Cout * 2 + 9 * Cin * 4 + 4 * Cout * 4   # pw (x2 bufs), dw, sco/sho
    avail = max(_block_budget() - fixed, 256 * 1024)
    cap = Ho if Ho <= _MAX_TH + _MAX_TH // 4 else _MAX_TH
    th = 1
    while th < cap and est(th + 1) <= avail:
        th += 1
    if th >= Ho:
        return Ho
    # Prefer (within ~2/3 of the cap) the block height that minimizes padded rows.
    best, best_waste = th, pl.cdiv(Ho, th) * th - Ho
    for cand in range(th - 1, max((2 * th) // 3, 1) - 1, -1):
        waste = pl.cdiv(Ho, cand) * cand - Ho
        if waste < best_waste:
            best, best_waste = cand, waste
            if waste == 0:
                break
    return best


def _sepconv_s1(x, sep, dil, input_relu, residual, out_relu):
    """Fused stride-1 SeparableConv2d tiled over (batch, row blocks).  The padded input stays
    in HBM (memory_space=pl.ANY) and each row block is DMA'd with double buffering."""
    N, H, W, Cin = x.shape
    Cout = sep['pw'].shape[1]
    Ho, Wo = H, W
    Wp = W + 2 * dil
    th = _pick_th(Ho, Wo, Cin, Cout, dil, residual is not None)
    n_hb = pl.cdiv(Ho, th)
    Hop = n_hb * th
    th_in = th + 2 * dil
    # fixed_padding (keff = 2*dil+1) plus extra bottom rows so Hop is a multiple of th.
    xp = jnp.pad(x, ((0, 0), (dil, dil + Hop - Ho), (dil, dil), (0, 0)))
    res = residual
    if res is not None and Hop != Ho:
        res = jnp.pad(res, ((0, 0), (0, Hop - Ho), (0, 0), (0, 0)))

    kernel = functools.partial(_sepconv_s1_kernel, th=th, Wo=Wo, dil=dil,
                               input_relu=input_relu, out_relu=out_relu,
                               has_res=res is not None, cdt=_dw_dtype())
    in_specs = [
        pl.BlockSpec(memory_space=pl.ANY),                # padded input stays in HBM
        pl.BlockSpec((9, Cin), lambda n, h: (0, 0)),
        pl.BlockSpec((Cin, Cout), lambda n, h: (0, 0)),
        pl.BlockSpec((1, Cout), lambda n, h: (0, 0)),
        pl.BlockSpec((1, Cout), lambda n, h: (0, 0)),
    ]
    args = [xp, sep['dw'], sep['pw'], sep['sco'], sep['sho']]
    if res is not None:
        in_specs.append(pl.BlockSpec((1, th, Wo, Cout), lambda n, h: (n, h, 0, 0)))
        args.append(res)
    out = pl.pallas_call(
        kernel,
        out_shape=jax.ShapeDtypeStruct((N, Hop, Wo, Cout), ACT_DTYPE),
        grid=(N, n_hb),
        in_specs=in_specs,
        out_specs=pl.BlockSpec((1, th, Wo, Cout), lambda n, h: (n, h, 0, 0)),
        scratch_shapes=[pltpu.VMEM((2, th_in, Wp, Cin), ACT_DTYPE),
                        pltpu.SemaphoreType.DMA((2,))],
        # hb must stay "arbitrary": the double-buffered DMA scratch carries state hb -> hb+1.
        # TODO(synk): on v7x, split the batch axis across the two TensorCores via core_map
        #             (hb cannot be marked parallel without breaking the prefetch chain).
        compiler_params=pltpu.CompilerParams(
            dimension_semantics=("parallel", "arbitrary"),
            vmem_limit_bytes=_vmem_limit()),
    )(*args)
    return out if Hop == Ho else out[:, :Ho]


def _sepconv_taps(x, sep, stride, dilation, input_relu, residual, out_relu):
    """SeparableConv2d via pre-extracted taps; used for stride!=1 layers and tiny-spatial
    stride-1 layers (flattening batch*H*W into the matmul M keeps the MXU fed)."""
    N, H, W, Cin = x.shape
    Cout = sep['pw'].shape[1]
    keff = 3 + 2 * (dilation - 1)
    pad = keff - 1
    pb, pe = pad // 2, pad - pad // 2
    xp = jnp.pad(x, ((0, 0), (pb, pe), (pb, pe), (0, 0)))
    Ho = (H + pad - keff) // stride + 1
    Wo = (W + pad - keff) // stride + 1
    M = N * Ho * Wo
    taps = []
    for kh in range(3):
        for kw in range(3):
            h0, w0 = kh * dilation, kw * dilation
            taps.append(xp[:, h0:h0 + (Ho - 1) * stride + 1:stride,
                              w0:w0 + (Wo - 1) * stride + 1:stride, :].reshape(M, Cin))
    taps = jnp.stack(taps, axis=0)                        # (9, M, Cin) bf16

    tm = min(_target_tm(), _round_up(M, 8))
    Mp = _round_up(M, tm)
    if Mp != M:
        taps = jnp.pad(taps, ((0, 0), (0, Mp - M), (0, 0)))
    n_steps = Mp // tm
    nbuf = 3 if n_steps >= 3 else None                    # deeper pipelining when worthwhile

    args = [taps, sep['dw'], sep['pw'], sep['sco'], sep['sho']]
    in_specs = [
        _maybe_buffered((9, tm, Cin), lambda i: (0, i, 0), nbuf),
        pl.BlockSpec((9, Cin), lambda i: (0, 0)),
        pl.BlockSpec((Cin, Cout), lambda i: (0, 0)),
        pl.BlockSpec((1, Cout), lambda i: (0, 0)),
        pl.BlockSpec((1, Cout), lambda i: (0, 0)),
    ]
    if residual is not None:
        resf = residual.reshape(M, Cout)
        if Mp != M:
            resf = jnp.pad(resf, ((0, Mp - M), (0, 0)))
        in_specs.append(pl.BlockSpec((tm, Cout), lambda i: (i, 0)))
        args.append(resf)

    kernel = functools.partial(_sepconv_taps_kernel, input_relu=input_relu,
                               out_relu=out_relu, has_res=residual is not None,
                               cdt=_dw_dtype())
    out = pl.pallas_call(
        kernel,
        out_shape=jax.ShapeDtypeStruct((Mp, Cout), ACT_DTYPE),
        grid=(n_steps,),
        in_specs=in_specs,
        out_specs=pl.BlockSpec((tm, Cout), lambda i: (i, 0)),
        compiler_params=pltpu.CompilerParams(
            dimension_semantics=("parallel",),
            vmem_limit_bytes=_vmem_limit()),
    )(*args)
    return out[:M].reshape(N, Ho, Wo, Cout)


def sepconv_bn(x, sep, stride, dilation, input_relu, residual=None, out_relu=False):
    N, H, W, Cin = x.shape
    tiny = H * W < 256 and 9 * N * H * W * Cin * 2 <= 4 * 1024 * 1024
    if stride != 1 or tiny:
        return _sepconv_taps(x, sep, stride, dilation, input_relu, residual, out_relu)
    return _sepconv_s1(x, sep, dilation, input_relu, residual, out_relu)


def block_forward(x, bp):
    """Xception Block: rep (ReLU/SepConv/BN units) + skip path, residual add fused into the
    last unit's kernel."""
    inp = x
    if bp['skip'] is not None:
        s = bp['skip']
        st = s['stride']
        xs = inp if st == 1 else inp[:, ::st, ::st, :]
        Ns, Hs, Ws, Ci = xs.shape
        y = matmul_bn(xs.reshape(Ns * Hs * Ws, Ci), s['w'], s['scale'], s['shift'])
        skip = y.reshape(Ns, Hs, Ws, -1)
    else:
        skip = inp
    h = inp
    units = bp['units']
    for i, u in enumerate(units):
        last = i == len(units) - 1
        h = sepconv_bn(h, u['sep'], u['stride'], u['dilation'],
                       input_relu=u['relu'], residual=skip if last else None)
    return h


# ----------------------------------------------------------------------------
# Deterministic parameter construction (mirrors PyTorch __init__ / _init_weight) with
# bf16 weights, 728->768 channel padding and BatchNorm fully folded.
# ----------------------------------------------------------------------------
class _KeyGen:
    def __init__(self, seed):
        self._key = jax.random.PRNGKey(seed)

    def __call__(self):
        self._key, sub = jax.random.split(self._key)
        return sub


def _init_conv(kg, kh, kw, cin, cout):
    std = math.sqrt(2.0 / (kh * kw * cout))
    return (std * jax.random.normal(kg(), (kh, kw, cin, cout))).astype(jnp.float32)


def _init_dw(kg, c):
    std = math.sqrt(2.0 / (3 * 3 * c))
    return (std * jax.random.normal(kg(), (3, 3, c))).astype(jnp.float32)


def _bn_vectors(c):
    gamma = jnp.ones((c,), jnp.float32)
    beta = jnp.zeros((c,), jnp.float32)
    running_mean = jnp.zeros((c,), jnp.float32)
    running_var = jnp.ones((c,), jnp.float32)
    scale = gamma / jnp.sqrt(running_var + EPS)
    shift = beta - running_mean * scale
    return scale, shift


def _init_bn(c, cp=None):
    cp = c if cp is None else cp
    scale, shift = _bn_vectors(c)
    scale = jnp.pad(scale, (0, cp - c)).reshape(1, cp)    # padded channels stay exactly zero
    shift = jnp.pad(shift, (0, cp - c)).reshape(1, cp)
    return scale.astype(jnp.float32), shift.astype(jnp.float32)


def _make_sep_unit(kg, cin, cout):
    """SeparableConv2d(cin, cout, 3) + the following BatchNorm(cout), with both BNs folded:
       inner scale into the depthwise weights, inner shift through the pointwise conv."""
    cpi, cpo = _cpad(cin), _cpad(cout)
    dw = _init_dw(kg, cin)                                # (3, 3, cin)
    sci, shi = _bn_vectors(cin)
    dw_eff = dw * sci.reshape(1, 1, cin)                  # fold inner BN scale
    dw_eff = jnp.pad(dw_eff, ((0, 0), (0, 0), (0, cpi - cin))).reshape(9, cpi)
    pw = _init_conv(kg, 1, 1, cin, cout)[0, 0]            # (cin, cout) f32
    sco, sho = _bn_vectors(cout)
    sho_eff = sho + sco * (shi @ pw)                      # fold inner BN shift through pw
    pw_p = jnp.pad(pw, ((0, cpi - cin), (0, cpo - cout))).astype(W_DTYPE)
    sco_p = jnp.pad(sco, (0, cpo - cout)).reshape(1, cpo).astype(jnp.float32)
    sho_p = jnp.pad(sho_eff, (0, cpo - cout)).reshape(1, cpo).astype(jnp.float32)
    return dict(dw=dw_eff.astype(jnp.float32), pw=pw_p, sco=sco_p, sho=sho_p)


def _make_block(kg, cin, cout, reps, stride, dilation,
                start_with_relu=True, grow_first=True, is_last=False):
    units = []
    filt = cin
    if grow_first:
        units.append(dict(relu=True, sep=_make_sep_unit(kg, cin, cout),
                          stride=1, dilation=dilation))
        filt = cout
    for _ in range(reps - 1):
        units.append(dict(relu=True, sep=_make_sep_unit(kg, filt, filt),
                          stride=1, dilation=dilation))
    if not grow_first:
        units.append(dict(relu=True, sep=_make_sep_unit(kg, cin, cout),
                          stride=1, dilation=dilation))
    if stride != 1:
        units.append(dict(relu=True, sep=_make_sep_unit(kg, cout, cout),
                          stride=stride, dilation=1))
    if stride == 1 and is_last:
        units.append(dict(relu=True, sep=_make_sep_unit(kg, cout, cout),
                          stride=1, dilation=1))
    if not start_with_relu:
        units[0]['relu'] = False
    skip = None
    if cout != cin or stride != 1:
        w = _init_conv(kg, 1, 1, cin, cout)[0, 0]
        sc, sh = _init_bn(cout, _cpad(cout))
        w = jnp.pad(w, ((0, _cpad(cin) - cin), (0, _cpad(cout) - cout))).astype(W_DTYPE)
        skip = dict(w=w, scale=sc, shift=sh, stride=stride)
    return dict(units=units, skip=skip)


def make_aligned_xception_params(seed=42, output_stride=16, blocks=(3, 2)):
    kg = _KeyGen(seed)
    if output_stride == 16:
        entry_block3_stride, middle_dil, exit_dils = 2, 1, (1, 2)
    elif output_stride == 8:
        entry_block3_stride, middle_dil, exit_dils = 1, 2, (2, 4)
    else:
        raise NotImplementedError
    p = {}
    w1 = _init_conv(kg, 3, 3, 3, 32)
    p['conv1'] = dict(w=w1.reshape(27, 32).astype(W_DTYPE), k=3)
    p['bn1'] = _init_bn(32)
    w2 = _init_conv(kg, 3, 3, 32, 64)
    p['conv2'] = dict(w=w2.reshape(288, 64).astype(W_DTYPE), k=3)
    p['bn2'] = _init_bn(64)
    # entry flow
    entry = [_make_block(kg, 64, 128, 2, 2, 1, start_with_relu=False, grow_first=True)]
    cin = 128
    for _ in range(1, blocks[0] - 1):
        entry.append(_make_block(kg, cin, 256, 2, 2, 1))
        cin = 256
    entry.append(_make_block(kg, cin, 728, 2, entry_block3_stride, 1, is_last=True))
    p['entry'] = entry
    # middle flow
    p['middle'] = [_make_block(kg, 728, 728, 3, 1, middle_dil) for _ in range(blocks[1])]
    # exit flow
    p['exit'] = _make_block(kg, 728, 1024, 2, 1, exit_dils[0],
                            grow_first=False, is_last=True)
    p['conv3'] = _make_sep_unit(kg, 1024, 1024)
    p['conv4'] = _make_sep_unit(kg, 1024, 1024)
    p['conv5'] = _make_sep_unit(kg, 1024, 1024)
    p['exit_dilation'] = exit_dils[1]
    return p


# ----------------------------------------------------------------------------
# Full forward pass
# ----------------------------------------------------------------------------
def aligned_xception_forward(params, x_nchw):
    x = jnp.transpose(x_nchw, (0, 2, 3, 1)).astype(ACT_DTYPE)         # NCHW -> NHWC
    x = conv2d_bn(x, params['conv1'], *params['bn1'], stride=2, padding=1, out_relu=True)
    x = conv2d_bn(x, params['conv2'], *params['bn2'], stride=1, padding=1, out_relu=True)
    for bp in params['entry']:
        x = block_forward(x, bp)
    for bp in params['middle']:
        x = block_forward(x, bp)
    x = block_forward(x, params['exit'])
    d = params['exit_dilation']
    # relu -> conv3 -> bn3 -> relu -> conv4 -> bn4 -> relu -> conv5 -> bn5 -> relu
    x = sepconv_bn(x, params['conv3'], 1, d, input_relu=True)
    x = sepconv_bn(x, params['conv4'], 1, d, input_relu=True)
    x = sepconv_bn(x, params['conv5'], 1, d, input_relu=True, out_relu=True)
    return jnp.transpose(x, (0, 3, 1, 2)).astype(jnp.float32)         # NHWC -> NCHW


if __name__ == "__main__":
    params = make_aligned_xception_params(seed=42, output_stride=16, blocks=(3, 2))
    # 128x128 input exercises the double-buffered multi-row-block path (n_hb > 1) in the
    # entry flow as well as the taps-based path for the small middle/exit feature maps.
    x = jax.random.normal(jax.random.PRNGKey(0), (2, 3, 128, 128), dtype=jnp.float32)
    out = aligned_xception_forward(params, x)
    out = jax.block_until_ready(out)
    assert out.shape == (2, 1024, 8, 8), out.shape
    assert bool(jnp.all(jnp.isfinite(out)))
    print("KERNEL_OK")
</pallas_src>

<mosaic_0001>
module attributes {stable_mosaic.version = 11 : i64} {
  func.func @_matmul_bn_kernel(%arg0: i32, %arg1: memref<256x27xbf16, #tpu.memory_space<vmem>>, %arg2: memref<27x32xbf16, #tpu.memory_space<vmem>>, %arg3: memref<1x32xf32, #tpu.memory_space<vmem>>, %arg4: memref<1x32xf32, #tpu.memory_space<vmem>>, %arg5: memref<256x32xbf16, #tpu.memory_space<vmem>>) attributes {dimension_semantics = [#tpu.dimension_semantics<parallel>], iteration_bounds = array<i64: 32>, scalar_prefetch = 0 : i64, scratch_operands = 0 : i64, tpu.core_type = #tpu.core_type<tc>, window_params = [{transform_indices = @transform_0, window_bounds = array<i64: 256, 27>}, {pipeline_mode = #tpu.pipeline_mode<synchronous>, transform_indices = @transform_1, window_bounds = array<i64: 27, 32>}, {pipeline_mode = #tpu.pipeline_mode<synchronous>, transform_indices = @transform_2, window_bounds = array<i64: 1, 32>}, {pipeline_mode = #tpu.pipeline_mode<synchronous>, transform_indices = @transform_3, window_bounds = array<i64: 1, 32>}, {transform_indices = @transform_4, window_bounds = array<i64: 256, 32>}]} {
    %c0 = arith.constant 0 : index
    %c0_0 = arith.constant 0 : index
    %0 = vector.load %arg1[%c0, %c0_0] : memref<256x27xbf16, #tpu.memory_space<vmem>>, vector<256x27xbf16>
    %c0_1 = arith.constant 0 : index
    %c0_2 = arith.constant 0 : index
    %1 = vector.load %arg2[%c0_1, %c0_2] : memref<27x32xbf16, #tpu.memory_space<vmem>>, vector<27x32xbf16>
    %cst = arith.constant dense<0.000000e+00> : vector<256x32xf32>
    %2 = tpu.matmul %0, %1, %cst {dimension_numbers = #tpu.dot_dimension_numbers<[1], [0], [0], [1], [0, 0, 1, 1], [], []>} : vector<256x27xbf16>, vector<27x32xbf16>, vector<256x32xf32> -> vector<256x32xf32>
    %c0_3 = arith.constant 0 : index
    %c0_4 = arith.constant 0 : index
    %3 = vector.load %arg3[%c0_3, %c0_4] : memref<1x32xf32, #tpu.memory_space<vmem>>, vector<1x32xf32>
    %4 = vector.broadcast %3 : vector<1x32xf32> to vector<256x32xf32>
    %5 = arith.mulf %2, %4 : vector<256x32xf32>
    %c0_5 = arith.constant 0 : index
    %c0_6 = arith.constant 0 : index
    %6 = vector.load %arg4[%c0_5, %c0_6] : memref<1x32xf32, #tpu.memory_space<vmem>>, vector<1x32xf32>
    %7 = vector.broadcast %6 : vector<1x32xf32> to vector<256x32xf32>
    %8 = arith.addf %5, %7 : vector<256x32xf32>
    %cst_7 = arith.constant 0.000000e+00 : f32
    %9 = vector.broadcast %cst_7 : f32 to vector<256x32xf32>
    %10 = arith.maximumf %8, %9 : vector<256x32xf32>
    %11 = arith.truncf %10 : vector<256x32xf32> to vector<256x32xbf16>
    %c0_8 = arith.constant 0 : index
    %c0_9 = arith.constant 0 : index
    %12 = vector.load %arg5[%c0_8, %c0_9] : memref<256x32xbf16, #tpu.memory_space<vmem>>, vector<256x32xbf16>
    tpu.vector_store %arg5[%c0_8, %c0_9], %11 {strides = array<i32>} : memref<256x32xbf16, #tpu.memory_space<vmem>>, vector<256x32xbf16>,
    return
  }
  func.func @transform_0(%arg0: i32) -> (i32, i32) {
    %c0_i32 = arith.constant 0 : i32
    %c0_i32_0 = arith.constant 0 : i32
    return %arg0, %c0_i32 : i32, i32
  }
  func.func @transform_1(%arg0: i32) -> (i32, i32) {
    %c0_i32 = arith.constant 0 : i32
    %c0_i32_0 = arith.constant 0 : i32
    %c0_i32_1 = arith.constant 0 : i32
    return %c0_i32, %c0_i32_0 : i32, i32
  }
  func.func @transform_2(%arg0: i32) -> (i32, i32) {
    %c0_i32 = arith.constant 0 : i32
    %c0_i32_0 = arith.constant 0 : i32
    %c0_i32_1 = arith.constant 0 : i32
    return %c0_i32, %c0_i32_0 : i32, i32
  }
  func.func @transform_3(%arg0: i32) -> (i32, i32) {
    %c0_i32 = arith.constant 0 : i32
    %c0_i32_0 = arith.constant 0 : i32
    %c0_i32_1 = arith.constant 0 : i32
    return %c0_i32, %c0_i32_0 : i32, i32
  }
  func.func @transform_4(%arg0: i32) -> (i32, i32) {
    %c0_i32 = arith.constant 0 : i32
    %c0_i32_0 = arith.constant 0 : i32
    return %arg0, %c0_i32 : i32, i32
  }
}

</mosaic_0001>

<bundles_post_ra>
// kernel: tpu_custom_call.1
= control target key start
LH: loop header
LB: loop body
LE: loop exit
PB: predicated region body
PF: predicated region fallthrough
CT: control target
= control target key end

     0   :  { %s1103_s15 = smov 0   ;;  %s1307_s0 = inlined_call_operand.vmem [shape: bf16[8192,27], index: 0, kind: input, shape index: {}]   ;;  %s1308_s1 = inlined_call_operand.vmem [shape: bf16[27,32], index: 1, kind: input, shape index: {}]   ;;  %s1309_s2 = inlined_call_operand.vmem [shape: f32[1,32], index: 2, kind: input, shape index: {}]   ;;  %s1310_s3 = inlined_call_operand.vmem [shape: f32[1,32], index: 3, kind: input, shape index: {}]   ;;  %s1311_s4 = inlined_call_operand.vmem [shape: bf16[8192,32], index: 4, kind: output, shape index: {}]  }
   0x1 LB: > { %s873_s16 = sadd.s32 4294967295, %s1075_s15   ;;  %p877_p0 = scmp.ge.s32.totalorder %s1075_s15, 1  ;;  %s1075_s15 = sphi %s1103_s15, %s14_s15  }
   0x2   : > { %p163_p1 = scmp.lt.s32.totalorder %s1075_s15, 33 }
   0x4   : > { %p164_p2 = pnand %p877_p0, %p163_p1 }
   0x5   : > { %s878_s19 = sshll.u32 (!%p164_p2), %s873_s16, 5 }
   0x6   : > { %167 = sbr.rel (%p164_p2) target bundleno = 259 (0x103), region = 36  ;;  %p190_p3 = scmp.lt.s32.totalorder (!%p164_p2), %s878_s19, 1023 }
   0xb   : > { %v1051_v0 = vld [vmem:[%s1308_s1 + $0x8] sm:$0x3f]   ;;  %vm378_vm0 = vcmask 1044480   ;;  %vm379_vm1 = vcmask 1045504   ;;  %v1077_v1 = vmov 65535   ;;  %v1052_v5 = vld [vmem:[%s1308_s1] sm:$0xff]  }
   0xc   : > { %v380_v2 = vsel %vm378_vm0, 4294967295, %v1077_v1  ;;  %s1313_s19 = smov (!%p190_p3, %s878_s19), 1023  ;;  %vm329_vm2 = vcmask 220160   ;;  %v1162_v22 = vld [vmem:[%s1309_s2] ss:$0 sm:$0xff]  ;;  %vm784_vm3 = vcmask 257024  }
   0xd   : > { %v381_v3 = vsel %vm379_vm1, %v380_v2, 0  ;;  %s879_s22 = sshll.u32 %s1313_s19, 2  ;;  %v1167_v24 = vld [vmem:[%s1310_s3] ss:$0 sm:$0xff] }
   0xe   : > { %v383_v4 = vand.u32 %v1051_v0, %v381_v3  ;;  %s1125_s25 = scalar_lea.vmem %s1307_s0, %s879_s22  ;;  %s1182_s6 = scalar_lea.vmem %s1311_s4, %s879_s22 }
   0xf   : > { %v1053_v6 = vld [vmem:[%s1125_s25] sm:$0xff]   ;;  %v1055_v8 = vld [vmem:[%s1125_s25 + $0x8] sm:$0xff]   ;;  %v1057_v10 = vld [vmem:[%s1125_s25 + $0x10] sm:$0xff]  }
  0x10   : > { %1002 = vmatprep.subr.bf16.mxu0 %v383_v4  ;;  %1038 = vmatprep.subr.bf16.mxu1 %v383_v4  ;;  %v1054_v7 = vld [vmem:[%s1125_s25 + $0x40] sm:$0xff]   ;;  %v1056_v9 = vld [vmem:[%s1125_s25 + $0x48] sm:$0xff]   ;;  %v1058_v11 = vld [vmem:[%s1125_s25 + $0x50] sm:$0xff]  }
  0x11   : > { %1003 = vmatpush3.bf16.msra.mxu0 %v383_v4  ;;  %1040 = vmatpush3.bf16.msra.mxu1 %v383_v4  ;;  %v1059_v12 = vld [vmem:[%s1125_s25 + $0x18] sm:$0xff]   ;;  %v1061_v14 = vld [vmem:[%s1125_s25 + $0x20] sm:$0xff]   ;;  %v1063_v16 = vld [vmem:[%s1125_s25 + $0x28] sm:$0xff]  }
  0x12   : > { %1004 = vmatprep.subr.bf16.mxu0 %v1052_v5  ;;  %1039 = vmatprep.subr.bf16.mxu1 %v1052_v5  ;;  %v1060_v13 = vld [vmem:[%s1125_s25 + $0x58] sm:$0xff]   ;;  %v1062_v15 = vld [vmem:[%s1125_s25 + $0x60] sm:$0xff]   ;;  %v1064_v17 = vld [vmem:[%s1125_s25 + $0x68] sm:$0xff]  }
  0x13   : > { %1006 = vmatprep.mubr.msk.bf16.mxu0 %vm329_vm2, %v1053_v6  ;;  %1022 = vmatprep.mubr.msk.bf16.mxu1 %vm329_vm2, %v1054_v7  ;;  %v1065_v18 = vld [vmem:[%s1125_s25 + $0x30] sm:$0xff]   ;;  %v1067_v20 = vld [vmem:[%s1125_s25 + $0x38] sm:$0xff]  }
  0x14   : > { %v1066_v19 = vld [vmem:[%s1125_s25 + $0x70] sm:$0xff]   ;;  %v1068_v21 = vld [vmem:[%s1125_s25 + $0x78] sm:$0xff]  }
  0x15   : > { %1005 = vmatpush3.bf16.msra.mxu0 %v1052_v5  ;;  %1041 = vmatpush3.bf16.msra.mxu1 %v1052_v5 }
  0x18   : > { %1007 = vmatmul.mubr.msk.bf16.vlgmr.msra.gmra.mxu0 %vm329_vm2, %v1055_v8  ;;  %1023 = vmatmul.mubr.msk.bf16.vlgmr.msra.gmra.mxu1 %vm329_vm2, %v1056_v9 }
  0x19   : > { %1010 = vmatprep.mubr.msk.bf16.mxu0 %vm329_vm2, %v1057_v10  ;;  %1026 = vmatprep.mubr.msk.bf16.mxu1 %vm329_vm2, %v1058_v11 }
  0x20   : > { %1011 = vmatmul.mubr.msk.bf16.gmra.mxu0 %vm329_vm2, %v1059_v12  ;;  %1027 = vmatmul.mubr.msk.bf16.gmra.mxu1 %vm329_vm2, %v1060_v13 }
  0x21   : > { %1014 = vmatprep.mubr.msk.bf16.mxu0 %vm329_vm2, %v1061_v14  ;;  %1030 = vmatprep.mubr.msk.bf16.mxu1 %vm329_vm2, %v1062_v15 }
  0x28   : > { %1015 = vmatmul.mubr.msk.bf16.gmra.mxu0 %vm329_vm2, %v1063_v16  ;;  %1031 = vmatmul.mubr.msk.bf16.gmra.mxu1 %vm329_vm2, %v1064_v17 }
  0x29   : > { %1018 = vmatprep.mubr.msk.bf16.mxu0 %vm329_vm2, %v1065_v18  ;;  %1034 = vmatprep.mubr.msk.bf16.mxu1 %vm329_vm2, %v1066_v19 }
  0x30   : > { %1019 = vmatmul.mubr.msk.bf16.gmra.mxu0 %vm329_vm2, %v1067_v20  ;;  %1035 = vmatmul.mubr.msk.bf16.gmra.mxu1 %vm329_vm2, %v1068_v21 }
  0xd8   : > { %v1008_v23 = vpop.f32.mrf.mxu0  ;;  %v1024_v25 = vpop.f32.mrf.mxu1 }
  0xd9   : > { %v555_v26 = vmul.f32 %v1008_v23, %v1162_v22  ;;  %v571_v27 = vmul.f32 %v1024_v25, %v1162_v22 }
  0xda   : > { %v419_v28 = vpop.f32.mrf.mxu0  ;;  %v483_v29 = vpop.f32.mrf.mxu1 }
  0xdb   : > { %v594_v30 = vadd.f32 %v1167_v24, %v555_v26  ;;  %v610_v31 = vadd.f32 %v1167_v24, %v571_v27  ;;  %v553_v32 = vmul.f32 %v1162_v22, %v419_v28  ;;  %v569_v33 = vmul.f32 %v1162_v22, %v483_v29 }
  0xdc   : > { %v1009_v34 = vpop.f32.mrf.mxu0  ;;  %v1025_v35 = vpop.f32.mrf.mxu1 }
  0xdd   : > { %v626_v36 = vmax.f32 %v594_v30, 0.0  ;;  %v642_v37 = vmax.f32 %v610_v31, 0.0  ;;  %v592_v38 = vadd.f32 %v1167_v24, %v553_v32  ;;  %v608_v39 = vadd.f32 %v1167_v24, %v569_v33 }
  0xde   : > { %v556_v40 = vmul.f32 %v1009_v34, %v1162_v22  ;;  %v572_v41 = vmul.f32 %v1025_v35, %v1162_v22  ;;  %v422_v42 = vpop.f32.mrf.mxu0  ;;  %v486_v43 = vpop.f32.mrf.mxu1 }
  0xdf   : > { %v954_v44 = vpack.c.bf16 %v626_v36, %v626_v36  ;;  %v970_v45 = vpack.c.bf16 %v642_v37, %v642_v37  ;;  %v624_v46 = vmax.f32 %v592_v38, 0.0  ;;  %v640_v47 = vmax.f32 %v608_v39, 0.0 }
  0xe0   : > { %v595_v48 = vadd.f32 %v1167_v24, %v556_v40  ;;  %v611_v49 = vadd.f32 %v1167_v24, %v572_v41  ;;  %v554_v50 = vmul.f32 %v1162_v22, %v422_v42  ;;  %v570_v51 = vmul.f32 %v1162_v22, %v486_v43  ;;  %v1012_v52 = vpop.f32.mrf.mxu0  ;;  %v1028_v53 = vpop.f32.mrf.mxu1 }
  0xe1   : > { %787 = vst.msk [vmem:[%s1182_s6 + $0x8] sm:$0xf] %vm784_vm3, %v954_v44  ;;  %803 = vst.msk [vmem:[%s1182_s6 + $0x48] sm:$0xf] %vm784_vm3, %v970_v45  ;;  %v952_v54 = vpack.c.bf16 %v624_v46, %v624_v46  ;;  %v968_v55 = vpack.c.bf16 %v640_v47, %v640_v47  ;;  %v559_v56 = vmul.f32 %v1012_v52, %v1162_v22 }
  0xe2   : > { %v575_v57 = vmul.f32 %v1028_v53, %v1162_v22  ;;  %v627_v58 = vmax.f32 %v595_v48, 0.0  ;;  %v643_v59 = vmax.f32 %v611_v49, 0.0  ;;  %v593_v60 = vadd.f32 %v1167_v24, %v554_v50  ;;  %v435_v62 = vpop.f32.mrf.mxu0  ;;  %v499_v63 = vpop.f32.mrf.mxu1 }
  0xe3   : > { %v609_v61 = vadd.f32 %v1167_v24, %v570_v51  ;;  %785 = vst.msk [vmem:[%s1182_s6] sm:$0xf] %vm784_vm3, %v952_v54  ;;  %801 = vst.msk [vmem:[%s1182_s6 + $0x40] sm:$0xf] %vm784_vm3, %v968_v55  ;;  %v598_v0 = vadd.f32 %v1167_v24, %v559_v56  ;;  %v557_v2 = vmul.f32 %v1162_v22, %v435_v62 }
  0xe4   : > { %v614_v1 = vadd.f32 %v1167_v24, %v575_v57  ;;  %v573_v3 = vmul.f32 %v1162_v22, %v499_v63  ;;  %v955_v4 = vpack.c.bf16 %v627_v58, %v627_v58  ;;  %v971_v5 = vpack.c.bf16 %v643_v59, %v643_v59  ;;  %v1013_v8 = vpop.f32.mrf.mxu0  ;;  %v1029_v9 = vpop.f32.mrf.mxu1 }
  0xe5   : > { %v625_v6 = vmax.f32 %v593_v60, 0.0  ;;  %v641_v7 = vmax.f32 %v609_v61, 0.0  ;;  %v630_v10 = vmax.f32 %v598_v0, 0.0  ;;  %v596_v12 = vadd.f32 %v1167_v24, %v557_v2 }
  0xe6   : > { %v646_v11 = vmax.f32 %v614_v1, 0.0  ;;  %v612_v13 = vadd.f32 %v1167_v24, %v573_v3  ;;  %788 = vst.msk [vmem:[%s1182_s6 + $0xc] sm:$0xf] %vm784_vm3, %v955_v4  ;;  %804 = vst.msk [vmem:[%s1182_s6 + $0x4c] sm:$0xf] %vm784_vm3, %v971_v5  ;;  %v560_v16 = vmul.f32 %v1013_v8, %v1162_v22  ;;  %v576_v17 = vmul.f32 %v1029_v9, %v1162_v22  ;;  %v438_v18 = vpop.f32.mrf.mxu0  ;;  %v502_v19 = vpop.f32.mrf.mxu1 }
  0xe7   : > { %v953_v14 = vpack.c.bf16 %v625_v6, %v625_v6  ;;  %v969_v15 = vpack.c.bf16 %v641_v7, %v641_v7  ;;  %v958_v20 = vpack.c.bf16 %v630_v10, %v630_v10  ;;  %v628_v23 = vmax.f32 %v596_v12, 0.0 }
  0xe8   : > { %v974_v21 = vpack.c.bf16 %v646_v11, %v646_v11  ;;  %v644_v25 = vmax.f32 %v612_v13, 0.0  ;;  %v599_v26 = vadd.f32 %v1167_v24, %v560_v16  ;;  %v615_v27 = vadd.f32 %v1167_v24, %v576_v17  ;;  %v1016_v30 = vpop.f32.mrf.mxu0  ;;  %v1032_v31 = vpop.f32.mrf.mxu1 }
  0xe9   : > { %786 = vst.msk [vmem:[%s1182_s6 + $0x4] sm:$0xf] %vm784_vm3, %v953_v14  ;;  %802 = vst.msk [vmem:[%s1182_s6 + $0x44] sm:$0xf] %vm784_vm3, %v969_v15  ;;  %v558_v28 = vmul.f32 %v1162_v22, %v438_v18  ;;  %v574_v29 = vmul.f32 %v1162_v22, %v502_v19  ;;  %v956_v32 = vpack.c.bf16 %v628_v23, %v628_v23 }
  0xea   : > { %791 = vst.msk [vmem:[%s1182_s6 + $0x18] sm:$0xf] %vm784_vm3, %v958_v20  ;;  %807 = vst.msk [vmem:[%s1182_s6 + $0x58] sm:$0xf] %vm784_vm3, %v974_v21  ;;  %v972_v33 = vpack.c.bf16 %v644_v25, %v644_v25  ;;  %v563_v34 = vmul.f32 %v1016_v30, %v1162_v22  ;;  %v579_v35 = vmul.f32 %v1032_v31, %v1162_v22  ;;  %v631_v36 = vmax.f32 %v599_v26, 0.0  ;;  %v451_v40 = vpop.f32.mrf.mxu0  ;;  %v515_v41 = vpop.f32.mrf.mxu1 }
  0xeb   : > { %v647_v37 = vmax.f32 %v615_v27, 0.0  ;;  %v597_v38 = vadd.f32 %v1167_v24, %v558_v28  ;;  %v613_v39 = vadd.f32 %v1167_v24, %v574_v29  ;;  %789 = vst.msk [vmem:[%s1182_s6 + $0x10] sm:$0xf] %vm784_vm3, %v956_v32  ;;  %v561_v44 = vmul.f32 %v1162_v22, %v451_v40 }
  0xec   : > { %805 = vst.msk [vmem:[%s1182_s6 + $0x50] sm:$0xf] %vm784_vm3, %v972_v33  ;;  %v602_v42 = vadd.f32 %v1167_v24, %v563_v34  ;;  %v618_v43 = vadd.f32 %v1167_v24, %v579_v35  ;;  %v577_v45 = vmul.f32 %v1162_v22, %v515_v41  ;;  %v959_v46 = vpack.c.bf16 %v631_v36, %v631_v36  ;;  %v1017_v50 = vpop.f32.mrf.mxu0  ;;  %v1033_v51 = vpop.f32.mrf.mxu1 }
  0xed   : > { %v975_v47 = vpack.c.bf16 %v647_v37, %v647_v37  ;;  %v629_v48 = vmax.f32 %v597_v38, 0.0  ;;  %v645_v49 = vmax.f32 %v613_v39, 0.0  ;;  %v600_v54 = vadd.f32 %v1167_v24, %v561_v44 }
  0xee   : > { %v634_v52 = vmax.f32 %v602_v42, 0.0  ;;  %v650_v53 = vmax.f32 %v618_v43, 0.0  ;;  %v616_v55 = vadd.f32 %v1167_v24, %v577_v45  ;;  %792 = vst.msk [vmem:[%s1182_s6 + $0x1c] sm:$0xf] %vm784_vm3, %v959_v46  ;;  %v564_v58 = vmul.f32 %v1017_v50, %v1162_v22  ;;  %v454_v60 = vpop.f32.mrf.mxu0  ;;  %v518_v61 = vpop.f32.mrf.mxu1 }
  0xef   : > { %808 = vst.msk [vmem:[%s1182_s6 + $0x5c] sm:$0xf] %vm784_vm3, %v975_v47  ;;  %v957_v56 = vpack.c.bf16 %v629_v48, %v629_v48  ;;  %v973_v57 = vpack.c.bf16 %v645_v49, %v645_v49  ;;  %v580_v59 = vmul.f32 %v1033_v51, %v1162_v22  ;;  %v632_v0 = vmax.f32 %v600_v54, 0.0 }
  0xf0   : > { %v962_v62 = vpack.c.bf16 %v634_v52, %v634_v52  ;;  %v978_v63 = vpack.c.bf16 %v650_v53, %v650_v53  ;;  %v648_v1 = vmax.f32 %v616_v55, 0.0  ;;  %v603_v2 = vadd.f32 %v1167_v24, %v564_v58  ;;  %v1020_v6 = vpop.f32.mrf.mxu0  ;;  %v1036_v7 = vpop.f32.mrf.mxu1 }
  0xf1   : > { %790 = vst.msk [vmem:[%s1182_s6 + $0x14] sm:$0xf] %vm784_vm3, %v957_v56  ;;  %806 = vst.msk [vmem:[%s1182_s6 + $0x54] sm:$0xf] %vm784_vm3, %v973_v57  ;;  %v619_v3 = vadd.f32 %v1167_v24, %v580_v59  ;;  %v562_v4 = vmul.f32 %v1162_v22, %v454_v60  ;;  %v578_v5 = vmul.f32 %v1162_v22, %v518_v61 }
  0xf2   : > { %795 = vst.msk [vmem:[%s1182_s6 + $0x28] sm:$0xf] %vm784_vm3, %v962_v62  ;;  %811 = vst.msk [vmem:[%s1182_s6 + $0x68] sm:$0xf] %vm784_vm3, %v978_v63  ;;  %v960_v8 = vpack.c.bf16 %v632_v0, %v632_v0  ;;  %v976_v9 = vpack.c.bf16 %v648_v1, %v648_v1  ;;  %v567_v10 = vmul.f32 %v1020_v6, %v1162_v22  ;;  %v635_v12 = vmax.f32 %v603_v2, 0.0  ;;  %v467_v16 = vpop.f32.mrf.mxu0  ;;  %v531_v17 = vpop.f32.mrf.mxu1 }
  0xf3   : > { %v583_v11 = vmul.f32 %v1036_v7, %v1162_v22  ;;  %v651_v13 = vmax.f32 %v619_v3, 0.0  ;;  %v601_v14 = vadd.f32 %v1167_v24, %v562_v4  ;;  %v617_v15 = vadd.f32 %v1167_v24, %v578_v5 }
  0xf4   : > { %793 = vst.msk [vmem:[%s1182_s6 + $0x20] sm:$0xf] %vm784_vm3, %v960_v8  ;;  %809 = vst.msk [vmem:[%s1182_s6 + $0x60] sm:$0xf] %vm784_vm3, %v976_v9  ;;  %v606_v18 = vadd.f32 %v1167_v24, %v567_v10  ;;  %v565_v20 = vmul.f32 %v1162_v22, %v467_v16  ;;  %v581_v21 = vmul.f32 %v1162_v22, %v531_v17  ;;  %v1021_v28 = vpop.f32.mrf.mxu0  ;;  %v1037_v29 = vpop.f32.mrf.mxu1 }
  0xf5   : > { %v622_v19 = vadd.f32 %v1167_v24, %v583_v11  ;;  %v963_v23 = vpack.c.bf16 %v635_v12, %v635_v12  ;;  %v979_v25 = vpack.c.bf16 %v651_v13, %v651_v13  ;;  %v633_v26 = vmax.f32 %v601_v14, 0.0 }
  0xf6   : > { %v649_v27 = vmax.f32 %v617_v15, 0.0  ;;  %v638_v30 = vmax.f32 %v606_v18, 0.0  ;;  %v604_v32 = vadd.f32 %v1167_v24, %v565_v20  ;;  %v620_v33 = vadd.f32 %v1167_v24, %v581_v21  ;;  %v470_v38 = vpop.f32.mrf.mxu0  ;;  %v534_v39 = vpop.f32.mrf.mxu1 }
  0xf7   : > { %v654_v31 = vmax.f32 %v622_v19, 0.0  ;;  %796 = vst.msk [vmem:[%s1182_s6 + $0x2c] sm:$0xf] %vm784_vm3, %v963_v23  ;;  %812 = vst.msk [vmem:[%s1182_s6 + $0x6c] sm:$0xf] %vm784_vm3, %v979_v25  ;;  %v961_v34 = vpack.c.bf16 %v633_v26, %v633_v26  ;;  %v568_v36 = vmul.f32 %v1021_v28, %v1162_v22  ;;  %v584_v37 = vmul.f32 %v1037_v29, %v1162_v22 }
  0xf8   : > { %v977_v35 = vpack.c.bf16 %v649_v27, %v649_v27  ;;  %v966_v40 = vpack.c.bf16 %v638_v30, %v638_v30  ;;  %v636_v42 = vmax.f32 %v604_v32, 0.0  ;;  %v652_v43 = vmax.f32 %v620_v33, 0.0 }
  0xf9   : > { %v982_v41 = vpack.c.bf16 %v654_v31, %v654_v31  ;;  %794 = vst.msk [vmem:[%s1182_s6 + $0x24] sm:$0xf] %vm784_vm3, %v961_v34  ;;  %v607_v44 = vadd.f32 %v1167_v24, %v568_v36  ;;  %v623_v45 = vadd.f32 %v1167_v24, %v584_v37  ;;  %v566_v46 = vmul.f32 %v1162_v22, %v470_v38 }
  0xfa   : > { %810 = vst.msk [vmem:[%s1182_s6 + $0x64] sm:$0xf] %vm784_vm3, %v977_v35  ;;  %v582_v47 = vmul.f32 %v1162_v22, %v534_v39  ;;  %799 = vst.msk [vmem:[%s1182_s6 + $0x38] sm:$0xf] %vm784_vm3, %v966_v40  ;;  %v964_v48 = vpack.c.bf16 %v636_v42, %v636_v42  ;;  %v980_v49 = vpack.c.bf16 %v652_v43, %v652_v43 }
  0xfb   : > { %815 = vst.msk [vmem:[%s1182_s6 + $0x78] sm:$0xf] %vm784_vm3, %v982_v41  ;;  %v639_v50 = vmax.f32 %v607_v44, 0.0  ;;  %v655_v51 = vmax.f32 %v623_v45, 0.0  ;;  %v605_v52 = vadd.f32 %v1167_v24, %v566_v46 }
  0xfc   : > { %v621_v53 = vadd.f32 %v1167_v24, %v582_v47  ;;  %797 = vst.msk [vmem:[%s1182_s6 + $0x30] sm:$0xf] %vm784_vm3, %v964_v48  ;;  %813 = vst.msk [vmem:[%s1182_s6 + $0x70] sm:$0xf] %vm784_vm3, %v980_v49 }
  0xfd   : > { %v967_v22 = vpack.c.bf16 %v639_v50, %v639_v50  ;;  %v983_v54 = vpack.c.bf16 %v655_v51, %v655_v51  ;;  %v637_v55 = vmax.f32 %v605_v52, 0.0 }
  0xfe   : > { %v653_v56 = vmax.f32 %v621_v53, 0.0 }
  0xff   : > { %800 = vst.msk [vmem:[%s1182_s6 + $0x3c] sm:$0xf] %vm784_vm3, %v967_v22  ;;  %816 = vst.msk [vmem:[%s1182_s6 + $0x7c] sm:$0xf] %vm784_vm3, %v983_v54  ;;  %v965_v57 = vpack.c.bf16 %v637_v55, %v637_v55 }
 0x100   : > { %v981_v58 = vpack.c.bf16 %v653_v56, %v653_v56 }
 0x101   : > { %798 = vst.msk [vmem:[%s1182_s6 + $0x34] sm:$0xf] %vm784_vm3, %v965_v57 }
 0x102   : > { %814 = vst.msk [vmem:[%s1182_s6 + $0x74] sm:$0xf] %vm784_vm3, %v981_v58 }
 0x103 PF: > { %s14_s15 = sadd.s32 1, %s1075_s15  }
 0x104   : > { %p11_p4 = scmp.ge.s32.totalorder %s14_s15, 34  }
 0x106   :  { %13 = sbr.rel (!%p11_p4) target bundleno = 1 (0x1), region = 66 }

</bundles_post_ra>
